<compile_context>
chip_gen: v5e
topology: v5e:2x2
jax: 0.10.0
libtpu: 0.0.40
codegen_flags: <defaults>
</compile_context>

<pallas_src>
import math

import jax
import jax.numpy as jnp
import numpy as np
from jax.experimental import pallas as pl
from jax.experimental.pallas import tpu as pltpu

POOL_SIZES = (1, 2, 3, 6)
BN_EPS = 1e-5
PACKED = 64  # 1 + 4 + 9 + 36 = 50 packed pooled columns, zero-padded to 64


def _cdiv(a, b):
    return -(-a // b)


# ----------------------------- glue: coefficient matrices -------------------

def adaptive_pool_matrix(P, H):
    """A[P, H]: adaptive average pooling weights (PyTorch bin semantics)."""
    A = np.zeros((P, H), dtype=np.float32)
    for p in range(P):
        start = (p * H) // P
        end = ((p + 1) * H + P - 1) // P  # ceil
        A[p, start:end] = 1.0 / (end - start)
    return A


def bilinear_up_matrix(H, P):
    """U[H, P]: bilinear upsample weights, align_corners=False (PyTorch)."""
    U = np.zeros((H, P), dtype=np.float32)
    for j in range(H):
        src = (j + 0.5) * (P / H) - 0.5
        src = max(src, 0.0)
        i0 = min(int(math.floor(src)), P - 1)
        i1 = min(i0 + 1, P - 1)
        w = src - i0
        U[j, i0] += 1.0 - w
        U[j, i1] += w
    return U


def packed_constants(H, W, C, Cout, hw_pad):
    """Packed pool [HWp,64], packed upsample [64,HWp], branch mask [C,64].

    Rows/columns beyond H*W (spatial zero-padding) are zero, so padded lanes
    contribute nothing to pooling and are discarded after upsampling.
    """
    HW = H * W
    sizes = [P * P for P in POOL_SIZES]
    offs = np.concatenate([[0], np.cumsum(sizes)])  # [0, 1, 5, 14, 50]
    pool_all = np.zeros((hw_pad, PACKED), np.float32)
    up_all = np.zeros((PACKED, hw_pad), np.float32)
    mask = np.zeros((C, PACKED), np.float32)
    for i, P in enumerate(POOL_SIZES):
        Ah, Aw = adaptive_pool_matrix(P, H), adaptive_pool_matrix(P, W)
        pool_all[:HW, offs[i]:offs[i + 1]] = np.kron(Ah, Aw).T
        Uh, Uw = bilinear_up_matrix(H, P), bilinear_up_matrix(W, P)
        up_all[offs[i]:offs[i + 1], :HW] = np.kron(Uh, Uw).T
        mask[i * Cout:(i + 1) * Cout, offs[i]:offs[i + 1]] = 1.0
    return pool_all, up_all, mask


# ----------------------------------- kernels --------------------------------

def pool_kernel(x_ref, pool_ref, pooled_ref, acc_ref):
    """Pass 1: packed adaptive avg-pool partial sums over one spatial split."""
    t = pl.program_id(2)

    @pl.when(t == 0)
    def _():
        acc_ref[...] = jnp.zeros_like(acc_ref)

    # x stays in its original dtype in HBM/VMEM (no wrapper-side bf16 copy);
    # cast to bf16 right before the dot so the MXU runs at bf16 rate (the VPU
    # cast hides under the HBM-bound DMA).  [C, T] @ [T, 64] -> [C, 64], f32 acc.
    acc_ref[...] += jnp.dot(x_ref[0].astype(jnp.bfloat16), pool_ref[...],
                            preferred_element_type=jnp.float32)

    @pl.when(t == pl.num_programs(2) - 1)
    def _():
        pooled_ref[0] = acc_ref[...]


def upsample_concat_kernel(x_ref, y_ref, up_ref, o_ref):
    """Pass 2: packed bilinear upsample + direct-slice concat [x, branches]."""
    C = x_ref.shape[1]
    # Passthrough channels: pure copy of the original-dtype x (bit-exact, no
    # bf16 round trip), written straight into its channel slice (no concat op).
    o_ref[0, :C, :] = x_ref[0].astype(o_ref.dtype)
    # All four upsampled branches in one matmul: [C, 64] @ [64, T] -> [C, T].
    branch = jnp.dot(y_ref[0], up_ref[...], preferred_element_type=jnp.float32)
    o_ref[0, C:, :] = branch.astype(o_ref.dtype)


# ----------------------------------- wrapper --------------------------------

def _vmem_budget():
    """Scoped-VMEM request: ~75% of physical VMEM, capped at 64 MiB.

    -> 64 MiB on v5e/v6e (128 MiB physical), 48 MiB on v7x (64 MiB physical),
    leaving headroom for Mosaic internal scratch.
    """
    try:
        phys = int(pltpu.get_tpu_info().vmem_capacity_bytes)
    except Exception:
        phys = 64 << 20  # conservative (v7x-sized) fallback
    return min(64 << 20, (phys * 3) // 4)


def _choose_tiling(HW, max_lanes):
    """Return (tile, padded_HW).

    `tile` is a multiple of 128 no wider than `max_lanes`; `padded_HW` is the
    smallest multiple of `tile` >= HW.  Prefer the widest tile whose padding
    inflates spatial traffic by <= ~15% over the 128-aligned minimum: big,
    lane-dense tiles dominate padding waste on these HBM-bound passes.
    """
    min_pad = 128 * _cdiv(HW, 128)
    cap = max(128, min(min_pad, (max_lanes // 128) * 128))
    tile, padded = 128, min_pad
    for T in range(128, cap + 1, 128):
        p = T * _cdiv(HW, T)
        if p <= int(min_pad * 1.15):
            tile, padded = T, p
    return tile, padded


def pyramid_pooling(x_nchw, conv_ws, bn_gammas, bn_betas, bn_means, bn_vars,
                    *, max_tile_lanes=None):
    N, C, H, W = x_nchw.shape
    assert C % 8 == 0, "channel count must be a multiple of 8 (sublane tiling)"
    Cout = C // 4
    HW = H * W
    out_dtype = x_nchw.dtype
    out_bytes = jnp.dtype(out_dtype).itemsize
    x_bytes = jnp.dtype(x_nchw.dtype).itemsize

    # ---- tiling / VMEM budget ----------------------------------------------
    vmem_limit = int(_vmem_budget())
    tile_budget = int(vmem_limit * 0.85)  # headroom inside the scoped limit
    # Pass 2 has the largest per-lane footprint (x in + 2C out + upsample
    # coeffs, each double-buffered); size the shared tile width from it.
    per_lane2 = 2 * (C * x_bytes + PACKED * 2 + 2 * C * out_bytes)
    fixed2 = 2 * C * PACKED * 2  # resident y_pack block (bf16, double-buffered)
    max_lanes = max(128, (tile_budget - fixed2) // per_lane2)
    if max_tile_lanes is not None:
        max_lanes = min(max_lanes, max_tile_lanes)
    T, HW_pad = _choose_tiling(HW, max_lanes)
    n_tiles = HW_pad // T
    # Split the pass-1 spatial reduction into two parallel groups so both
    # TensorCores of a v7x megacore stay busy at small batch.
    S = 2 if (n_tiles % 2 == 0 and n_tiles >= 2) else 1
    TPS = n_tiles // S

    # ---- inputs: keep x in its original dtype (no bf16 materialization) -----
    x_flat = x_nchw.reshape(N, C, HW)
    if HW_pad != HW:
        x_flat = jnp.pad(x_flat, ((0, 0), (0, 0), (0, HW_pad - HW)))

    # ---- packed coefficients / folded BatchNorm (eval mode) -----------------
    pool_np, up_np, mask_np = packed_constants(H, W, C, Cout, HW_pad)
    pool_all = jnp.asarray(pool_np, dtype=jnp.bfloat16)            # [HWp, 64]
    up_all = jnp.asarray(up_np, dtype=jnp.bfloat16)                # [64, HWp]
    mask = jnp.asarray(mask_np, dtype=jnp.float32)                 # [C, 64]

    w_rows, b_rows = [], []
    for i in range(4):
        scale = bn_gammas[i] / jnp.sqrt(bn_vars[i] + BN_EPS)       # [Cout]
        w_rows.append(conv_ws[i][:, :, 0, 0] * scale[:, None])     # [Cout, C]
        b_rows.append(bn_betas[i] - bn_means[i] * scale)           # [Cout]
    w_pack = jnp.concatenate(w_rows, axis=0).astype(jnp.float32)   # [C, C]
    b_pack = jnp.concatenate(b_rows).astype(jnp.float32)           # [C]

    # ---- pass 1: packed adaptive-avg-pool partial sums ----------------------
    pooled_parts = pl.pallas_call(
        pool_kernel,
        out_shape=jax.ShapeDtypeStruct((N * S, C, PACKED), jnp.float32),
        grid_spec=pltpu.PrefetchScalarGridSpec(
            num_scalar_prefetch=0,
            grid=(N, S, TPS),
            in_specs=[
                pl.BlockSpec((1, C, T), lambda n, s, t: (n, 0, s * TPS + t)),
                pl.BlockSpec((T, PACKED), lambda n, s, t: (s * TPS + t, 0)),
            ],
            out_specs=pl.BlockSpec((1, C, PACKED),
                                   lambda n, s, t: (n * S + s, 0, 0)),
            scratch_shapes=[pltpu.VMEM((C, PACKED), jnp.float32)],
        ),
        compiler_params=pltpu.CompilerParams(
            dimension_semantics=("parallel", "parallel", "arbitrary"),
            vmem_limit_bytes=vmem_limit),
    )(x_flat, pool_all)

    # Tiny epilogue (N*C*64 elements): sum the split partials and apply the
    # packed 1x1 conv with folded BatchNorm + bias + ReLU + branch block-mask.
    # Kept in plain f32 XLA: it is O(N*C*C*64) flops on a few-hundred-KB
    # activation (negligible vs. the HBM-bound passes), it keeps the big conv
    # weights out of kernel VMEM entirely, and it is what allows the split
    # ("parallel") pass-1 reduction above.
    pooled = pooled_parts.reshape(N, S, C, PACKED).sum(axis=1)      # [N, C, 64]
    y = jnp.einsum("oc,ncp->nop", w_pack, pooled) + b_pack[None, :, None]
    y_pack = (jnp.maximum(y, 0.0) * mask[None]).astype(jnp.bfloat16)

    # ---- pass 2: packed bilinear upsample + concat -> [N, 2C, HW_pad] -------
    out_flat = pl.pallas_call(
        upsample_concat_kernel,
        out_shape=jax.ShapeDtypeStruct((N, 2 * C, HW_pad), out_dtype),
        grid_spec=pltpu.PrefetchScalarGridSpec(
            num_scalar_prefetch=0,
            grid=(N, n_tiles),
            in_specs=[
                pl.BlockSpec((1, C, T), lambda n, t: (n, 0, t)),
                pl.BlockSpec((1, C, PACKED), lambda n, t: (n, 0, 0)),
                pl.BlockSpec((PACKED, T), lambda n, t: (0, t)),
            ],
            out_specs=pl.BlockSpec((1, 2 * C, T), lambda n, t: (n, 0, t)),
        ),
        compiler_params=pltpu.CompilerParams(
            dimension_semantics=("parallel", "parallel"),
            vmem_limit_bytes=vmem_limit),
    )(x_flat, y_pack, up_all)

    if HW_pad != HW:
        out_flat = out_flat[:, :, :HW]
    return out_flat.reshape(N, 2 * C, H, W)


# Pure-f32 JAX reference (PyTorch eval-mode semantics) for a sanity check.
def reference(x_nchw, conv_ws, bn_gammas, bn_betas, bn_means, bn_vars):
    N, C, H, W = x_nchw.shape
    x_flat = x_nchw.reshape(N, C, H * W).astype(jnp.float32)
    outs = [x_flat]
    for i, P in enumerate(POOL_SIZES):
        scale = bn_gammas[i] / jnp.sqrt(bn_vars[i] + BN_EPS)
        wf = conv_ws[i][:, :, 0, 0] * scale[:, None]
        bf = bn_betas[i] - bn_means[i] * scale
        poolT = jnp.asarray(np.kron(adaptive_pool_matrix(P, H),
                                    adaptive_pool_matrix(P, W)).T)
        upT = jnp.asarray(np.kron(bilinear_up_matrix(H, P),
                                  bilinear_up_matrix(W, P)).T)
        pooled = jnp.einsum("ncx,xp->ncp", x_flat, poolT)
        y = jnp.maximum(jnp.einsum("oc,ncp->nop", wf, pooled)
                        + bf[None, :, None], 0.0)
        outs.append(jnp.einsum("nop,px->nox", y, upT))
    return jnp.concatenate(outs, axis=1).reshape(N, 2 * C, H, W)


if __name__ == "__main__":
    def make_params(key, C):
        Cout = C // 4
        conv_ws, gam, bet, mean, var = [], [], [], [], []
        keys = jax.random.split(key, 4 * 5)
        for i in range(4):
            k = keys[5 * i: 5 * (i + 1)]
            conv_ws.append(jax.random.normal(k[0], (Cout, C, 1, 1),
                                             jnp.float32) * 0.2)
            gam.append(1.0 + 0.1 * jax.random.normal(k[1], (Cout,), jnp.float32))
            bet.append(0.1 * jax.random.normal(k[2], (Cout,), jnp.float32))
            mean.append(0.1 * jax.random.normal(k[3], (Cout,), jnp.float32))
            var.append(0.5 + jax.random.uniform(k[4], (Cout,), jnp.float32))
        return conv_ws, gam, bet, mean, var

    key = jax.random.PRNGKey(0)
    kx1, kp1, kx2, kp2 = jax.random.split(key, 4)

    # Case 1: lane-aligned spatial size (HW = 256), default tiling.
    N, C, H, W = 2, 8, 16, 16
    x = jax.random.normal(kx1, (N, C, H, W), dtype=jnp.float32)
    params = make_params(kp1, C)
    out = jax.block_until_ready(pyramid_pooling(x, *params))
    ref = reference(x, *params)
    assert out.shape == (N, 2 * C, H, W), out.shape
    err = float(jnp.max(jnp.abs(out - ref)))
    assert jnp.allclose(out, ref, atol=2e-2, rtol=2e-2), err
    # Passthrough half of the concat must be bit-exact (no bf16 round trip).
    assert bool(jnp.all(out[:, :C] == x)), "passthrough not bit-exact"

    # Case 2: HW = 450 (not a multiple of 128) with a forced 128-wide tile so
    # the spatial padding (450 -> 512), split-reduction (S=2) and multi-step
    # accumulation (2 tiles per split) paths are all exercised.
    N2, C2, H2, W2 = 1, 8, 15, 30
    x2 = jax.random.normal(kx2, (N2, C2, H2, W2), dtype=jnp.float32)
    params2 = make_params(kp2, C2)
    out2 = jax.block_until_ready(
        pyramid_pooling(x2, *params2, max_tile_lanes=128))
    ref2 = reference(x2, *params2)
    assert out2.shape == (N2, 2 * C2, H2, W2), out2.shape
    err2 = float(jnp.max(jnp.abs(out2 - ref2)))
    assert jnp.allclose(out2, ref2, atol=2e-2, rtol=2e-2), err2
    assert bool(jnp.all(out2[:, :C2] == x2)), "passthrough not bit-exact"

    print("KERNEL_OK")
</pallas_src>

<mosaic_0001>
module attributes {stable_mosaic.version = 11 : i64} {
  func.func @pool_kernel(%arg0: i32, %arg1: i32, %arg2: i32, %arg3: memref<1x8x256xf32, #tpu.memory_space<vmem>>, %arg4: memref<256x64xbf16, #tpu.memory_space<vmem>>, %arg5: memref<1x8x64xf32, #tpu.memory_space<vmem>>, %arg6: memref<8x64xf32, #tpu.memory_space<vmem>>) attributes {dimension_semantics = [#tpu.dimension_semantics<parallel>, #tpu.dimension_semantics<parallel>, #tpu.dimension_semantics<arbitrary>], iteration_bounds = array<i64: 2, 1, 1>, scalar_prefetch = 0 : i64, scratch_operands = 1 : i64, tpu.core_type = #tpu.core_type<tc>, window_params = [{transform_indices = @transform_0, window_bounds = array<i64: 1, 8, 256>}, {transform_indices = @transform_1, window_bounds = array<i64: 256, 64>}, {transform_indices = @transform_2, window_bounds = array<i64: 1, 8, 64>}]} {
    %c0_i32 = arith.constant 0 : i32
    %0 = arith.cmpi eq, %arg2, %c0_i32 : i32
    %1 = arith.extui %0 : i1 to i32
    %c0_i32_0 = arith.constant 0 : i32
    %2 = arith.cmpi ne, %1, %c0_i32_0 : i32
    scf.if %2 {
      %cst_11 = arith.constant 0.000000e+00 : f32
      %14 = vector.broadcast %cst_11 : f32 to vector<8x64xf32>
      %c0_12 = arith.constant 0 : index
      %c0_13 = arith.constant 0 : index
      %15 = vector.load %arg6[%c0_12, %c0_13] : memref<8x64xf32, #tpu.memory_space<vmem>>, vector<8x64xf32>
      tpu.vector_store %arg6[%c0_12, %c0_13], %14 {strides = array<i32>} : memref<8x64xf32, #tpu.memory_space<vmem>>, vector<8x64xf32>,
    } else {
    }
    %c0 = arith.constant 0 : index
    %c0_1 = arith.constant 0 : index
    %3 = vector.load %arg6[%c0, %c0_1] : memref<8x64xf32, #tpu.memory_space<vmem>>, vector<8x64xf32>
    %c0_2 = arith.constant 0 : index
    %c0_3 = arith.constant 0 : index
    %c0_4 = arith.constant 0 : index
    %4 = vector.load %arg3[%c0_2, %c0_3, %c0_4] : memref<1x8x256xf32, #tpu.memory_space<vmem>>, vector<1x8x256xf32>
    %5 = vector.shape_cast %4 : vector<1x8x256xf32> to vector<8x256xf32>
    %6 = arith.truncf %5 : vector<8x256xf32> to vector<8x256xbf16>
    %c0_5 = arith.constant 0 : index
    %c0_6 = arith.constant 0 : index
    %7 = vector.load %arg4[%c0_5, %c0_6] : memref<256x64xbf16, #tpu.memory_space<vmem>>, vector<256x64xbf16>
    %cst = arith.constant dense<0.000000e+00> : vector<8x64xf32>
    %8 = tpu.matmul %6, %7, %cst {dimension_numbers = #tpu.dot_dimension_numbers<[1], [0], [0], [1], [0, 0, 1, 1], [], []>} : vector<8x256xbf16>, vector<256x64xbf16>, vector<8x64xf32> -> vector<8x64xf32>
    %9 = arith.addf %3, %8 : vector<8x64xf32>
    %c0_7 = arith.constant 0 : index
    %c0_8 = arith.constant 0 : index
    %10 = vector.load %arg6[%c0_7, %c0_8] : memref<8x64xf32, #tpu.memory_space<vmem>>, vector<8x64xf32>
    tpu.vector_store %arg6[%c0_7, %c0_8], %9 {strides = array<i32>} : memref<8x64xf32, #tpu.memory_space<vmem>>, vector<8x64xf32>,
    %c0_i32_9 = arith.constant 0 : i32
    %11 = arith.cmpi eq, %arg2, %c0_i32_9 : i32
    %12 = arith.extui %11 : i1 to i32
    %c0_i32_10 = arith.constant 0 : i32
    %13 = arith.cmpi ne, %12, %c0_i32_10 : i32
    scf.if %13 {
      %c0_11 = arith.constant 0 : index
      %c0_12 = arith.constant 0 : index
      %14 = vector.load %arg6[%c0_11, %c0_12] : memref<8x64xf32, #tpu.memory_space<vmem>>, vector<8x64xf32>
      %c0_13 = arith.constant 0 : index
      %c0_14 = arith.constant 0 : index
      %c0_15 = arith.constant 0 : index
      %15 = vector.load %arg5[%c0_13, %c0_14, %c0_15] : memref<1x8x64xf32, #tpu.memory_space<vmem>>, vector<1x8x64xf32>
      %16 = vector.shape_cast %15 : vector<1x8x64xf32> to vector<8x64xf32>
      %17 = vector.shape_cast %14 : vector<8x64xf32> to vector<1x8x64xf32>
      tpu.vector_store %arg5[%c0_13, %c0_14, %c0_15], %17 {strides = array<i32>} : memref<1x8x64xf32, #tpu.memory_space<vmem>>, vector<1x8x64xf32>,
    } else {
    }
    return
  }
  func.func @transform_0(%arg0: i32, %arg1: i32, %arg2: i32) -> (i32, i32, i32) {
    %c1_i32 = arith.constant 1 : i32
    %0 = arith.muli %arg1, %c1_i32 : i32
    %1 = arith.addi %0, %arg2 : i32
    %c0_i32 = arith.constant 0 : i32
    %c0_i32_0 = arith.constant 0 : i32
    return %arg0, %c0_i32, %1 : i32, i32, i32
  }
  func.func @transform_1(%arg0: i32, %arg1: i32, %arg2: i32) -> (i32, i32) {
    %c1_i32 = arith.constant 1 : i32
    %0 = arith.muli %arg1, %c1_i32 : i32
    %1 = arith.addi %0, %arg2 : i32
    %c0_i32 = arith.constant 0 : i32
    %c0_i32_0 = arith.constant 0 : i32
    return %1, %c0_i32 : i32, i32
  }
  func.func @transform_2(%arg0: i32, %arg1: i32, %arg2: i32) -> (i32, i32, i32) {
    %c1_i32 = arith.constant 1 : i32
    %0 = arith.muli %arg0, %c1_i32 : i32
    %1 = arith.addi %0, %arg1 : i32
    %c0_i32 = arith.constant 0 : i32
    %c0_i32_0 = arith.constant 0 : i32
    %c0_i32_1 = arith.constant 0 : i32
    return %1, %c0_i32, %c0_i32_0 : i32, i32, i32
  }
}

</mosaic_0001>

<bundles_post_ra>
// kernel: tpu_custom_call.1
= control target key start
LH: loop header
LB: loop body
LE: loop exit
PB: predicated region body
PF: predicated region fallthrough
CT: control target
= control target key end

     0   :  { %7 = vsyncpa [#allocation4], 0  ;;  %s892_s0 = inlined_call_operand.vmem [shape: f32[2,8,256], index: 0, kind: input, shape index: {}]   ;;  %s893_s1 = inlined_call_operand.vmem [shape: bf16[256,64], index: 1, kind: input, shape index: {}]   ;;  %s894_s2 = inlined_call_operand.hbm [shape: f32[2,8,64], index: 2, kind: output, shape index: {}]  }
   0x1   :  { %9 = vsyncpa [#allocation4 + $0x1], 0  ;;  %s744_s9 = smov 0   ;;  %s746_s10 = smov 0  }
   0x2   :  { %s748_s11 = smov 0   ;;  %s750_s12 = smov 0  }
   0x3   :  { %s752_s13 = smov 0   ;;  %s754_s14 = smov 0  }
   0x4 LB: > { %s498_s15 = sadd.s32 4294967295, %s726_s14   ;;  %s499_s16 = sadd.s32 4294967294, %s726_s14   ;;  %s726_s14 = sphi %s754_s14, %s15_s14   ;;  %s722_s13 = sphi %s752_s13, %s901_s13   ;;  %s718_s12 = sphi %s750_s12, %s900_s12   ;;  %s714_s11 = sphi %s748_s11, %s899_s11   ;;  %s710_s10 = sphi %s746_s10, %s898_s10   ;;  %s706_s9 = sphi %s744_s9, %s897_s9  }
   0x5   : > { %s34_s17 = sadd.s32 1, %s722_s13  ;;  %s101_s18 = sadd.s32 1, %s714_s11 }
   0x6   : > { %p36_p0 = scmp.ge.s32.totalorder %s34_s17, 2  ;;  %p111_p1 = scmp.ne.s32.totalorder %s714_s11, %s710_s10 }
   0x7   : > { %p112_p2 = scmp.eq.s32.totalorder %s498_s15, 1  ;;  %p117_p3 = scmp.ne.s32.totalorder %s710_s10, %s706_s9 }
   0x8   : > { %s903_s17 = smov (%p36_p0, %s34_s17), 0  ;;  %p118_p5 = scmp.eq.s32.totalorder %s499_s16, 1 }
   0x9   : > { %p784_p4 = por %p112_p2, %p111_p1  ;;  %s98_s20 = ssub.s32 %s722_s13, %s903_s17 }
   0xa   : > { %p503_p6 = scmp.ge.s32.totalorder %s726_s14, 1  ;;  %p99_p7 = scmp.eq.s32.totalorder %s98_s20, 0 }
   0xb   : > { %p791_p8 = por %p118_p5, %p117_p3  ;;  %p162_p9 = scmp.lt.s32.totalorder %s726_s14, 3 }
   0xc   : > { %s797_s22 = scalar_select %p99_p7, %s714_s11, %s101_s18  }
   0xd   : > { %p163_p10 = pnand %p503_p6, %p162_p9 }
   0xe   : > { %p197_p11 = scmp.lt.s32.totalorder (!%p163_p10), %s718_s12, 1  ;;  %s192_s24 = sand.u32 (!%p163_p10), 1, %s710_s10  }
   0xf   : > { %166 = sbr.rel (%p163_p10) target bundleno = 194 (0xc2), region = 28  ;;  %s572_s26 = sshll.u32 (!%p163_p10), %s718_s12, 3 }
  0x10   : > { %s401_s29 = scalar_lea.hbm (!%p163_p10), %s894_s2, %s572_s26  ;;  %s390_s5 = scalar_lea.sflag (!%p163_p10), [#allocation4], %s192_s24 }
  0x11   : > { %s405_s4 = sshll.u32 (!%p163_p10), %s401_s29, 4  ;;  %s406_s4 = int_to_ptr.hbm [resolvable:$true] %s405_s4 }
  0x14   : > { %v583_v0 = vld [vmem:[%s893_s1 + $0x38] sm:$0xff]  ;;  %v582_v2 = vld [vmem:[%s893_s1 + $0x30] sm:$0xff]  ;;  %v581_v4 = vld [vmem:[%s893_s1 + $0x28] sm:$0xff]  ;;  %s198_s25 = scalar_select %p197_p11, %s718_s12, 1  ;;  %vm220_vm0 = vcmask 523264   ;;  %v728_v20 = vmov 0.0  }
  0x15   : > { %v591_v1 = vld [vmem:[%s893_s1 + $0x78] sm:$0xff]  ;;  %355 = vmatpush.bf16.msra.mxu0 %v583_v0  ;;  %v590_v3 = vld [vmem:[%s893_s1 + $0x70] sm:$0xff]  ;;  %v589_v5 = vld [vmem:[%s893_s1 + $0x68] sm:$0xff]  ;;  %221 = vst.msk [vmem:[#allocation2] sm:$0xff] %vm220_vm0, %v728_v20  ;;  %s662_s12 = sshra.s32 %s406_s4, 4  ;;  %s663_s12 = int_to_ptr.hbm [resolvable:$true] %s662_s12 }
  0x16   : > { %368 = vmatpush.bf16.msra.mxu1 %v591_v1  ;;  %v580_v6 = vld [vmem:[%s893_s1 + $0x20] sm:$0xff]  ;;  %v579_v8 = vld [vmem:[%s893_s1 + $0x18] sm:$0xff]  ;;  %v578_v10 = vld [vmem:[%s893_s1 + $0x10] sm:$0xff]  ;;  %s575_s30 = sshll.u32 %s198_s25, 4  ;;  %s504_s25 = sshll.u32 %s192_s24, 3 }
  0x17   : > { %v588_v7 = vld [vmem:[%s893_s1 + $0x60] sm:$0xff]  ;;  %v587_v9 = vld [vmem:[%s893_s1 + $0x58] sm:$0xff]  ;;  %v586_v11 = vld [vmem:[%s893_s1 + $0x50] sm:$0xff]  ;;  %s204_s15 = scalar_lea.vmem %s892_s0, %s575_s30  ;;  %s194_s30 = scalar_lea.vmem [#allocation3], %s504_s25 }
  0x18   : > { %v577_v12 = vld [vmem:[%s893_s1 + $0x8] sm:$0xff]  ;;  %v576_v14 = vld [vmem:[%s893_s1] sm:$0xff]  ;;  %s403_s3 = sshll.u32 %s194_s30, 4  ;;  %s664_s6 = scalar_lea.hbm %s663_s12, 8  ;;  %s404_s3 = int_to_ptr.vmem [resolvable:$true] %s403_s3 }
  0x19   : > { %356 = vmatpush.bf16.msra.mxu0 %v582_v2  ;;  %v585_v13 = vld [vmem:[%s893_s1 + $0x48] sm:$0xff]  ;;  %v584_v15 = vld [vmem:[%s893_s1 + $0x40] sm:$0xff]  ;;  %p665_p12 = scmp.ne.s32.totalorder %s663_s12, %s664_s6  ;;  %p669_p1 = scmp.lt.s32.totalorder %s663_s12, %s894_s2 }
  0x1a   : > { %369 = vmatpush.bf16.msra.mxu1 %v590_v3  ;;  %v223_v16 = vld [vmem:[%s204_s15] sm:$0xff]  ;;  %v224_v17 = vld [vmem:[%s204_s15 + $0x8] sm:$0xff]  ;;  %s668_s15 = scalar_lea.hbm %s894_s2, 16 }
  0x1b   : > { %v225_v18 = vpack.c.bf16 %v223_v16, %v223_v16  ;;  %v226_v19 = vpack.c.bf16 %v224_v17, %v224_v17  ;;  %p666_p13 = pnand %p665_p12, %p784_p4  ;;  %p670_p2 = scmp.lt.s32.totalorder %s668_s15, %s664_s6 }
  0x1c   : > { %v222_v22 = vld [vmem:[#allocation2] sm:$0xff] }
  0x1d   : > { %357 = vmatpush.bf16.msra.mxu0 %v581_v4  ;;  %p667_p0 = pneg %p666_p13  ;;  %p671_p3 = por %p670_p2, %p669_p1 }
  0x1e   : > { %370 = vmatpush.bf16.msra.mxu1 %v589_v5 }
  0x1f   : > { %p672_p5 = pnand %p671_p3, %p667_p0 }
  0x21   : > { %358 = vmatpush.bf16.msra.mxu0 %v580_v6 }
  0x22   : > { %371 = vmatpush.bf16.msra.mxu1 %v588_v7 }
  0x25   : > { %359 = vmatpush.bf16.msra.mxu0 %v579_v8 }
  0x26   : > { %372 = vmatpush.bf16.msra.mxu1 %v587_v9 }
  0x29   : > { %360 = vmatpush.bf16.msra.mxu0 %v578_v10 }
  0x2a   : > { %373 = vmatpush.bf16.msra.mxu1 %v586_v11 }
  0x2d   : > { %361 = vmatpush.bf16.msra.mxu0 %v577_v12 }
  0x2e   : > { %374 = vmatpush.bf16.msra.mxu1 %v585_v13 }
  0x31   : > { %362 = vmatpush.bf16.msra.mxu0 %v576_v14 }
  0x32   : > { %375 = vmatpush.bf16.msra.mxu1 %v584_v15 }
  0x34   : > { %363 = vmatmul.bf16.vlgmr.msra.gmra.mxu0 %v225_v18 }
  0x35   : > { %376 = vmatmul.bf16.vlgmr.msra.gmra.mxu1 %v226_v19 }
  0xb1   : > { %v364_v21 = vpop.f32.mrf.mxu0 }
  0xb2   : > { %v377_v23 = vpop.f32.mrf.mxu1 }
  0xb3   : > { %v378_v24 = vadd.f32 %v377_v23, %v364_v21 }
  0xb5   : > { %v381_v25 = vadd.f32 %v378_v24, %v222_v22 }
  0xb7   : > { %383 = vst.msk [vmem:[#allocation2] sm:$0xff] %vm220_vm0, %v381_v25 }
  0xb9   : > { %v366_v26 = vpop.f32.mrf.mxu0 }
  0xba   : > { %v379_v27 = vpop.f32.mrf.mxu1 }
  0xbe   : > { %v387_v28 = vld [vmem:[#allocation2] sm:$0xff] }
  0xbf   : > { %388 = vst.msk [vmem:[%s194_s30] sm:$0xff] %vm220_vm0, %v387_v28 }
  0xc0   : > { %675 = shalt.err (!%p672_p5)
}
  0xc1   : > { %592 = dma.vmem_to_hbm [thread:$0]  (%p784_p4), %s404_s3, 128, %s406_s4, %s390_s5  }
  0xc2 PF: > { %p598_p6 = scmp.ge.s32.totalorder %s726_s14, 2  ;;  %s417_s20 = sand.u32 1, %s706_s9  }
  0xc3   : > { %s418_s23 = scalar_lea.sflag [#allocation4], %s417_s20 }
  0xc4   : > { %p595_p7 = pnand %p598_p6, %p791_p8 }
  0xc6   : > { %p596_p9 = pneg %p595_p7 }
  0xc8   : > { %701 = dma.done.wait (%p596_p9), %s418_s23, 128  }
  0xc9   : > { %703 = vsyncadd (%p596_p9), %s418_s23, 4294967168  ;;  %s15_s14 = sadd.s32 1, %s726_s14   ;;  %s897_s9 = smov %s710_s10 }
  0xca   : > { %p12_p10 = scmp.ge.s32.totalorder %s15_s14, 4   ;;  %s898_s10 = smov %s714_s11 }
  0xcb   : > { %s899_s11 = smov %s797_s22  ;;  %s900_s12 = smov %s722_s13 }
  0xcc   : > { %s901_s13 = smov %s903_s17  ;;  %14 = sbr.rel (!%p12_p10) target bundleno = 4 (0x4), region = 74 }
  0xd1   :  { %424 = vsyncpa [#allocation4], 1 }
  0xd2   :  { %426 = vsyncpa [#allocation4 + $0x1], 1 }

</bundles_post_ra>
